<compile_context>
chip_gen: v6e
topology: v6e:2x2x1
jax: 0.10.0
libtpu: 0.0.40
codegen_flags: <defaults>
</compile_context>

<pallas_src>
import jax
import jax.numpy as jnp
from jax import lax
from jax.experimental import pallas as pl
from jax.experimental.pallas import tpu as pltpu


def _conv_relu_even_odd(x_ref, w_ref, b_ref, pad_ref):
    """Conv1d(k=3, p=1) + bias + ReLU for one batch tile.

    x_ref is in pool-packed NLC layout (bn, Lh, 2*Cin): packed row p holds the
    two pooling partners x[2p] and x[2p+1] side by side on the lane axis.
    Weights arrive pre-packed as w_ref (4, 2*Cin, Cout):
        [0] current row -> even positions   ([w1; w2])
        [1] previous row -> even positions  ([0 ; w0])
        [2] current row -> odd positions    ([w0; w1])
        [3] next row -> odd positions       ([w2; 0 ])
    Zero padding at the sequence ends comes from pad_ref, a per-sample padded
    VMEM scratch of shape (bn, Lh+2, 2*Cin).

    Returns (y_even, y_odd), each (bn*Lh, Cout) float32.
    """
    bn, Lh, Cin2 = x_ref.shape
    Mh = bn * Lh
    cdt = w_ref.dtype
    f32 = jnp.float32

    x3 = x_ref[...]                                        # (bn, Lh, 2*Cin) f32
    zrow = jnp.zeros((bn, 1, Cin2), f32)
    pad_ref[:, pl.ds(0, 1), :] = zrow                      # left zero pad (per sample)
    pad_ref[:, pl.ds(Lh + 1, 1), :] = zrow                 # right zero pad (per sample)
    pad_ref[:, pl.ds(1, Lh), :] = x3

    xc = x3.reshape(Mh, Cin2)                              # packed rows p
    xp = pad_ref[:, pl.ds(0, Lh), :].reshape(Mh, Cin2)     # rows p-1 (zero at p == 0)
    xn = pad_ref[:, pl.ds(2, Lh), :].reshape(Mh, Cin2)     # rows p+1 (zero at p == Lh-1)

    b = b_ref[...]                                         # (1, Cout) f32
    ye = jnp.dot(xc.astype(cdt), w_ref[0], preferred_element_type=f32)
    ye = ye + jnp.dot(xp.astype(cdt), w_ref[1], preferred_element_type=f32)
    yo = jnp.dot(xc.astype(cdt), w_ref[2], preferred_element_type=f32)
    yo = yo + jnp.dot(xn.astype(cdt), w_ref[3], preferred_element_type=f32)
    ye = jnp.maximum(ye + b, 0.0)                          # bias + ReLU
    yo = jnp.maximum(yo + b, 0.0)
    return ye, yo


def _conv_stats_kernel(x_ref, w_ref, b_ref, sum_ref, m2_ref, pad_ref):
    """Pass 1: per-tile per-channel sum and centered M2 of conv+ReLU output."""
    ye, yo = _conv_relu_even_odd(x_ref, w_ref, b_ref, pad_ref)
    Mh = ye.shape[0]
    f32 = jnp.float32
    # Cross-sublane reductions as ones-row matmuls: ride the (slack) MXU instead
    # of XLU rotate chains.
    ones = jnp.ones((1, Mh), f32)
    ts = (jnp.dot(ones, ye, preferred_element_type=f32)
          + jnp.dot(ones, yo, preferred_element_type=f32))            # (1, Cout)
    tmean = ts * (1.0 / (2.0 * Mh))
    de = ye - tmean
    do = yo - tmean
    tm2 = (jnp.dot(ones, de * de, preferred_element_type=f32)
           + jnp.dot(ones, do * do, preferred_element_type=f32))      # (1, Cout)
    sum_ref[...] = ts.reshape(1, 1, -1)
    m2_ref[...] = tm2.reshape(1, 1, -1)


def _conv_bn_pool_kernel(x_ref, w_ref, b_ref, scale_ref, shift_ref, o_ref, pad_ref):
    """Pass 2: recompute conv+ReLU, BN affine (precomputed scale/shift),
    MaxPool1d(2,2) as max(even, odd); one dense full-block store."""
    ye, yo = _conv_relu_even_odd(x_ref, w_ref, b_ref, pad_ref)
    bn, Lh, _ = x_ref.shape
    Cout = o_ref.shape[-1]
    s = scale_ref[...]                                     # (1, Cout)
    t = shift_ref[...]
    # max(BN(a), BN(b)) computed exactly on both branches (scale may be < 0).
    o_ref[...] = jnp.maximum(ye * s + t, yo * s + t).reshape(bn, Lh, Cout)


def _vmem_limit_bytes():
    """Scoped-VMEM limit: ~70% of physical, capped at 64 MiB.
    -> 64 MiB on v5e/v6e (128 MiB physical), ~44 MiB on v7x (64 MiB physical)."""
    cap = 128 << 20
    try:
        info = pltpu.get_tpu_info()
        cap = int(getattr(info, "vmem_capacity_bytes", cap))
    except Exception:
        pass
    return int(min(cap * 7 // 10, 64 << 20))


def _pick_block_n(N, per_sample_bytes, budget_bytes):
    """Largest batch-tile that fits the budget, keeping the grid >= 2 (and even
    when possible) so both v7x TensorCores get work on the 'parallel' axis."""
    cap = max(1, int(budget_bytes // max(per_sample_bytes, 1)))
    if N >= 2:
        cap = min(cap, N // 2)
    base = N // 2 if (N % 2 == 0 and N >= 2) else N
    bn = max(1, min(cap, base))
    while base % bn:
        bn -= 1
    return bn


def basic_conv_block(x_ncl, w, b, gamma, beta, *, eps=1e-5):
    """x_ncl: (N, C_in, L) PyTorch NCL.  Returns (N, C_out, L//2)."""
    N, Cin, L = x_ncl.shape
    Cout, Cin_w, K = w.shape
    assert K == 3 and Cin_w == Cin
    assert L % 2 == 0, "pool-packed layout requires an even sequence length"
    Lh = L // 2
    Cin2 = 2 * Cin
    f32 = jnp.float32

    # bf16 MXU inputs (f32 accumulation) only when the contraction / output
    # widths make the MXU path the dominant cost.  Small shapes stay f32.
    use_bf16 = (Cin2 >= 128) and (Cout >= 128)
    cdt = jnp.bfloat16 if use_bf16 else f32

    # NCL -> NLC (channels on lanes), then a free contiguous reshape packing the
    # pooling partners (rows 2p, 2p+1) onto the lane axis.
    x_nlc = jnp.transpose(x_ncl, (0, 2, 1)).astype(f32)
    x_pack = x_nlc.reshape(N, Lh, Cin2)

    # Weight packing for the even/odd formulation: wt[k] = w[:, :, k].T (Cin, Cout).
    wt = jnp.transpose(w, (2, 1, 0)).astype(f32)           # (K, Cin, Cout)
    z = jnp.zeros((Cin, Cout), f32)
    w_pack = jnp.stack([
        jnp.concatenate([wt[1], wt[2]], axis=0),           # even, current packed row
        jnp.concatenate([z,     wt[0]], axis=0),           # even, previous packed row
        jnp.concatenate([wt[0], wt[1]], axis=0),           # odd,  current packed row
        jnp.concatenate([wt[2], z    ], axis=0),           # odd,  next packed row
    ], axis=0).astype(cdt)                                  # (4, 2*Cin, Cout)
    b2 = b.reshape(1, Cout).astype(f32)

    # ---- tiling: size batch tiles against the real VMEM budget -------------
    vmem_limit = _vmem_limit_bytes()
    w_itemsize = 2 if use_bf16 else 4
    fixed = 2 * (4 * Cin2 * Cout * w_itemsize + 4 * 4 * Cout)   # weights/bias/scale/shift
    budget = max(vmem_limit - fixed, vmem_limit // 4)
    # Per-sample working set (double-buffered input/output + main temporaries
    # + pad scratch), with headroom.  Under the recompute design both passes
    # have essentially the same footprint, so each gets its own (equal) pick.
    per_sample = 4 * L * (8 * Cin + 6 * Cout) + 4 * (Lh + 2) * Cin2
    bn1 = _pick_block_n(N, per_sample, budget)
    bn2 = _pick_block_n(N, per_sample, budget)
    G1, G2 = N // bn1, N // bn2

    cparams = pltpu.CompilerParams(dimension_semantics=("parallel",),
                                   vmem_limit_bytes=vmem_limit)

    # ---- pass 1: conv + bias + ReLU -> per-tile per-channel (sum, M2) ------
    psum, pm2 = pl.pallas_call(
        _conv_stats_kernel,
        grid=(G1,),
        in_specs=[
            pl.BlockSpec((bn1, Lh, Cin2), lambda i: (i, 0, 0)),
            pl.BlockSpec((4, Cin2, Cout), lambda i: (0, 0, 0)),
            pl.BlockSpec((1, Cout), lambda i: (0, 0)),
        ],
        out_specs=(
            pl.BlockSpec((1, 1, Cout), lambda i: (i, 0, 0)),
            pl.BlockSpec((1, 1, Cout), lambda i: (i, 0, 0)),
        ),
        out_shape=(
            jax.ShapeDtypeStruct((G1, 1, Cout), f32),
            jax.ShapeDtypeStruct((G1, 1, Cout), f32),
        ),
        scratch_shapes=[pltpu.VMEM((bn1, Lh + 2, Cin2), f32)],
        compiler_params=cparams,
    )(x_pack, w_pack, b2)
    psum = psum[:, 0, :]                                   # (G1, Cout)
    pm2 = pm2[:, 0, :]

    # ---- combine per-tile stats (Chan) -> BN scale/shift (tiny XLA math) ---
    cnt_tile = jnp.float32(bn1 * L)
    total = jnp.float32(N * L)
    tile_mean = psum / cnt_tile                            # (G1, Cout)
    mean = jnp.sum(psum, axis=0, keepdims=True) / total    # (1, Cout)
    m2 = (jnp.sum(pm2, axis=0, keepdims=True)
          + jnp.sum(cnt_tile * (tile_mean - mean) ** 2, axis=0, keepdims=True))
    var = m2 / total                                       # biased variance (BN training)
    scale = gamma.reshape(1, Cout).astype(f32) * lax.rsqrt(var + eps)
    shift = beta.reshape(1, Cout).astype(f32) - mean * scale

    # ---- pass 2: recompute conv + bias + ReLU, BN affine, MaxPool1d(2, 2) --
    out_nlc = pl.pallas_call(
        _conv_bn_pool_kernel,
        grid=(G2,),
        in_specs=[
            pl.BlockSpec((bn2, Lh, Cin2), lambda i: (i, 0, 0)),
            pl.BlockSpec((4, Cin2, Cout), lambda i: (0, 0, 0)),
            pl.BlockSpec((1, Cout), lambda i: (0, 0)),
            pl.BlockSpec((1, Cout), lambda i: (0, 0)),
            pl.BlockSpec((1, Cout), lambda i: (0, 0)),
        ],
        out_specs=pl.BlockSpec((bn2, Lh, Cout), lambda i: (i, 0, 0)),
        out_shape=jax.ShapeDtypeStruct((N, Lh, Cout), f32),
        scratch_shapes=[pltpu.VMEM((bn2, Lh + 2, Cin2), f32)],
        compiler_params=cparams,
    )(x_pack, w_pack, b2, scale, shift)

    # NLC -> PyTorch NCL.
    return jnp.transpose(out_nlc, (0, 2, 1))               # (N, Cout, Lh)


def reference(x_ncl, w, b, gamma, beta):
    """Pure-JAX reference with identical semantics (NCL layout)."""
    N, Cin, L = x_ncl.shape
    Cout, _, K = w.shape
    xp = jnp.pad(x_ncl, ((0, 0), (0, 0), (1, 1)))
    y = jnp.zeros((N, Cout, L), jnp.float32)
    for k in range(K):
        y = y + jnp.einsum('nil,oi->nol', xp[:, :, k:k + L], w[:, :, k])
    y = y + b[None, :, None]
    y = jnp.maximum(y, 0.0)
    mean = jnp.mean(y, axis=(0, 2), keepdims=True)
    var = jnp.mean((y - mean) ** 2, axis=(0, 2), keepdims=True)
    y = (y - mean) / jnp.sqrt(var + 1e-5)
    y = y * gamma[None, :, None] + beta[None, :, None]
    return y.reshape(N, Cout, L // 2, 2).max(axis=-1)


if __name__ == "__main__":
    N, C_IN, C_OUT, L = 2, 4, 8, 16
    K = 3

    key = jax.random.PRNGKey(0)
    kx, kw, kb, kg, kbeta = jax.random.split(key, 5)

    x = jax.random.normal(kx, (N, C_IN, L), dtype=jnp.float32)
    w = jax.random.normal(kw, (C_OUT, C_IN, K), dtype=jnp.float32) / jnp.sqrt(C_IN * K)
    b = 0.1 * jax.random.normal(kb, (C_OUT,), dtype=jnp.float32)
    # Random (possibly negative) BN affine params to exercise the full path.
    gamma = 1.0 + 0.5 * jax.random.normal(kg, (C_OUT,), dtype=jnp.float32)
    beta = 0.1 * jax.random.normal(kbeta, (C_OUT,), dtype=jnp.float32)

    fn = jax.jit(basic_conv_block)
    out = jax.block_until_ready(fn(x, w, b, gamma, beta))

    ref = reference(x, w, b, gamma, beta)
    assert out.shape == (N, C_OUT, L // 2), out.shape
    err = float(jnp.max(jnp.abs(out - ref)))
    assert jnp.allclose(out, ref, atol=1e-4, rtol=1e-4), err

    print("KERNEL_OK")
</pallas_src>

<mosaic_0001>
module attributes {stable_mosaic.version = 11 : i64} {
  func.func @_conv_stats_kernel(%arg0: i32, %arg1: memref<1x8x8xf32, #tpu.memory_space<vmem>>, %arg2: memref<4x8x8xf32, #tpu.memory_space<vmem>>, %arg3: memref<1x8xf32, #tpu.memory_space<vmem>>, %arg4: memref<1x1x8xf32, #tpu.memory_space<vmem>>, %arg5: memref<1x1x8xf32, #tpu.memory_space<vmem>>, %arg6: memref<1x10x8xf32, #tpu.memory_space<vmem>>) attributes {dimension_semantics = [#tpu.dimension_semantics<parallel>], iteration_bounds = array<i64: 2>, scalar_prefetch = 0 : i64, scratch_operands = 1 : i64, tpu.core_type = #tpu.core_type<tc>, window_params = [{transform_indices = @transform_0, window_bounds = array<i64: 1, 8, 8>}, {pipeline_mode = #tpu.pipeline_mode<synchronous>, transform_indices = @transform_1, window_bounds = array<i64: 4, 8, 8>}, {pipeline_mode = #tpu.pipeline_mode<synchronous>, transform_indices = @transform_2, window_bounds = array<i64: 1, 8>}, {transform_indices = @transform_3, window_bounds = array<i64: 1, 1, 8>}, {transform_indices = @transform_4, window_bounds = array<i64: 1, 1, 8>}]} {
    %c0 = arith.constant 0 : index
    %c0_0 = arith.constant 0 : index
    %c0_1 = arith.constant 0 : index
    %0 = vector.load %arg1[%c0, %c0_0, %c0_1] : memref<1x8x8xf32, #tpu.memory_space<vmem>>, vector<1x8x8xf32>
    %cst = arith.constant 0.000000e+00 : f32
    %1 = vector.broadcast %cst : f32 to vector<1x1x8xf32>
    %c0_2 = arith.constant 0 : index
    %c0_3 = arith.constant 0 : index
    %c0_4 = arith.constant 0 : index
    %2 = vector.load %arg6[%c0_2, %c0_3, %c0_4] : memref<1x10x8xf32, #tpu.memory_space<vmem>>, vector<1x1x8xf32>
    tpu.vector_store %arg6[%c0_2, %c0_3, %c0_4], %1 {strides = array<i32>} : memref<1x10x8xf32, #tpu.memory_space<vmem>>, vector<1x1x8xf32>,
    %c0_5 = arith.constant 0 : index
    %c9 = arith.constant 9 : index
    %c0_6 = arith.constant 0 : index
    %3 = vector.load %arg6[%c0_5, %c9, %c0_6] : memref<1x10x8xf32, #tpu.memory_space<vmem>>, vector<1x1x8xf32>
    tpu.vector_store %arg6[%c0_5, %c9, %c0_6], %1 {strides = array<i32>} : memref<1x10x8xf32, #tpu.memory_space<vmem>>, vector<1x1x8xf32>,
    %c0_7 = arith.constant 0 : index
    %c1 = arith.constant 1 : index
    %c0_8 = arith.constant 0 : index
    %4 = vector.load %arg6[%c0_7, %c1, %c0_8] : memref<1x10x8xf32, #tpu.memory_space<vmem>>, vector<1x8x8xf32>
    tpu.vector_store %arg6[%c0_7, %c1, %c0_8], %0 {strides = array<i32>} : memref<1x10x8xf32, #tpu.memory_space<vmem>>, vector<1x8x8xf32>,
    %5 = vector.shape_cast %0 : vector<1x8x8xf32> to vector<8x8xf32>
    %c0_9 = arith.constant 0 : index
    %c0_10 = arith.constant 0 : index
    %c0_11 = arith.constant 0 : index
    %6 = vector.load %arg6[%c0_9, %c0_10, %c0_11] : memref<1x10x8xf32, #tpu.memory_space<vmem>>, vector<1x8x8xf32>
    %7 = vector.shape_cast %6 : vector<1x8x8xf32> to vector<8x8xf32>
    %c0_12 = arith.constant 0 : index
    %c2 = arith.constant 2 : index
    %c0_13 = arith.constant 0 : index
    %8 = vector.load %arg6[%c0_12, %c2, %c0_13] : memref<1x10x8xf32, #tpu.memory_space<vmem>>, vector<1x8x8xf32>
    %9 = vector.shape_cast %8 : vector<1x8x8xf32> to vector<8x8xf32>
    %c0_14 = arith.constant 0 : index
    %c0_15 = arith.constant 0 : index
    %10 = vector.load %arg3[%c0_14, %c0_15] : memref<1x8xf32, #tpu.memory_space<vmem>>, vector<1x8xf32>
    %c0_16 = arith.constant 0 : index
    %c0_17 = arith.constant 0 : index
    %c0_18 = arith.constant 0 : index
    %11 = vector.load %arg2[%c0_16, %c0_17, %c0_18] : memref<4x8x8xf32, #tpu.memory_space<vmem>>, vector<1x8x8xf32>
    %12 = vector.shape_cast %11 : vector<1x8x8xf32> to vector<8x8xf32>
    %cst_19 = arith.constant dense<0.000000e+00> : vector<8x8xf32>
    %13 = tpu.matmul %5, %12, %cst_19 {dimension_numbers = #tpu.dot_dimension_numbers<[1], [0], [0], [1], [0, 0, 1, 1], [], []>} : vector<8x8xf32>, vector<8x8xf32>, vector<8x8xf32> -> vector<8x8xf32>
    %c1_20 = arith.constant 1 : index
    %c0_21 = arith.constant 0 : index
    %c0_22 = arith.constant 0 : index
    %14 = vector.load %arg2[%c1_20, %c0_21, %c0_22] : memref<4x8x8xf32, #tpu.memory_space<vmem>>, vector<1x8x8xf32>
    %15 = vector.shape_cast %14 : vector<1x8x8xf32> to vector<8x8xf32>
    %cst_23 = arith.constant dense<0.000000e+00> : vector<8x8xf32>
    %16 = tpu.matmul %7, %15, %cst_23 {dimension_numbers = #tpu.dot_dimension_numbers<[1], [0], [0], [1], [0, 0, 1, 1], [], []>} : vector<8x8xf32>, vector<8x8xf32>, vector<8x8xf32> -> vector<8x8xf32>
    %17 = arith.addf %13, %16 : vector<8x8xf32>
    %c2_24 = arith.constant 2 : index
    %c0_25 = arith.constant 0 : index
    %c0_26 = arith.constant 0 : index
    %18 = vector.load %arg2[%c2_24, %c0_25, %c0_26] : memref<4x8x8xf32, #tpu.memory_space<vmem>>, vector<1x8x8xf32>
    %19 = vector.shape_cast %18 : vector<1x8x8xf32> to vector<8x8xf32>
    %cst_27 = arith.constant dense<0.000000e+00> : vector<8x8xf32>
    %20 = tpu.matmul %5, %19, %cst_27 {dimension_numbers = #tpu.dot_dimension_numbers<[1], [0], [0], [1], [0, 0, 1, 1], [], []>} : vector<8x8xf32>, vector<8x8xf32>, vector<8x8xf32> -> vector<8x8xf32>
    %c3 = arith.constant 3 : index
    %c0_28 = arith.constant 0 : index
    %c0_29 = arith.constant 0 : index
    %21 = vector.load %arg2[%c3, %c0_28, %c0_29] : memref<4x8x8xf32, #tpu.memory_space<vmem>>, vector<1x8x8xf32>
    %22 = vector.shape_cast %21 : vector<1x8x8xf32> to vector<8x8xf32>
    %cst_30 = arith.constant dense<0.000000e+00> : vector<8x8xf32>
    %23 = tpu.matmul %9, %22, %cst_30 {dimension_numbers = #tpu.dot_dimension_numbers<[1], [0], [0], [1], [0, 0, 1, 1], [], []>} : vector<8x8xf32>, vector<8x8xf32>, vector<8x8xf32> -> vector<8x8xf32>
    %24 = arith.addf %20, %23 : vector<8x8xf32>
    %25 = vector.broadcast %10 : vector<1x8xf32> to vector<8x8xf32>
    %26 = arith.addf %17, %25 : vector<8x8xf32>
    %cst_31 = arith.constant 0.000000e+00 : f32
    %27 = vector.broadcast %cst_31 : f32 to vector<8x8xf32>
    %28 = arith.maximumf %26, %27 : vector<8x8xf32>
    %29 = vector.broadcast %10 : vector<1x8xf32> to vector<8x8xf32>
    %30 = arith.addf %24, %29 : vector<8x8xf32>
    %cst_32 = arith.constant 0.000000e+00 : f32
    %31 = vector.broadcast %cst_32 : f32 to vector<8x8xf32>
    %32 = arith.maximumf %30, %31 : vector<8x8xf32>
    %cst_33 = arith.constant 1.000000e+00 : f32
    %33 = vector.broadcast %cst_33 : f32 to vector<1x8xf32>
    %cst_34 = arith.constant dense<0.000000e+00> : vector<1x8xf32>
    %34 = tpu.matmul %33, %28, %cst_34 {dimension_numbers = #tpu.dot_dimension_numbers<[1], [0], [0], [1], [0, 0, 1, 1], [], []>} : vector<1x8xf32>, vector<8x8xf32>, vector<1x8xf32> -> vector<1x8xf32>
    %cst_35 = arith.constant dense<0.000000e+00> : vector<1x8xf32>
    %35 = tpu.matmul %33, %32, %cst_35 {dimension_numbers = #tpu.dot_dimension_numbers<[1], [0], [0], [1], [0, 0, 1, 1], [], []>} : vector<1x8xf32>, vector<8x8xf32>, vector<1x8xf32> -> vector<1x8xf32>
    %36 = arith.addf %34, %35 : vector<1x8xf32>
    %cst_36 = arith.constant 6.250000e-02 : f32
    %37 = vector.broadcast %cst_36 : f32 to vector<1x8xf32>
    %38 = arith.mulf %36, %37 : vector<1x8xf32>
    %39 = vector.broadcast %38 : vector<1x8xf32> to vector<8x8xf32>
    %40 = arith.subf %28, %39 : vector<8x8xf32>
    %41 = vector.broadcast %38 : vector<1x8xf32> to vector<8x8xf32>
    %42 = arith.subf %32, %41 : vector<8x8xf32>
    %43 = arith.mulf %40, %40 : vector<8x8xf32>
    %cst_37 = arith.constant dense<0.000000e+00> : vector<1x8xf32>
    %44 = tpu.matmul %33, %43, %cst_37 {dimension_numbers = #tpu.dot_dimension_numbers<[1], [0], [0], [1], [0, 0, 1, 1], [], []>} : vector<1x8xf32>, vector<8x8xf32>, vector<1x8xf32> -> vector<1x8xf32>
    %45 = arith.mulf %42, %42 : vector<8x8xf32>
    %cst_38 = arith.constant dense<0.000000e+00> : vector<1x8xf32>
    %46 = tpu.matmul %33, %45, %cst_38 {dimension_numbers = #tpu.dot_dimension_numbers<[1], [0], [0], [1], [0, 0, 1, 1], [], []>} : vector<1x8xf32>, vector<8x8xf32>, vector<1x8xf32> -> vector<1x8xf32>
    %47 = arith.addf %44, %46 : vector<1x8xf32>
    %48 = vector.shape_cast %36 : vector<1x8xf32> to vector<1x1x8xf32>
    %c0_39 = arith.constant 0 : index
    %c0_40 = arith.constant 0 : index
    %c0_41 = arith.constant 0 : index
    %49 = vector.load %arg4[%c0_39, %c0_40, %c0_41] : memref<1x1x8xf32, #tpu.memory_space<vmem>>, vector<1x1x8xf32>
    tpu.vector_store %arg4[%c0_39, %c0_40, %c0_41], %48 {strides = array<i32>} : memref<1x1x8xf32, #tpu.memory_space<vmem>>, vector<1x1x8xf32>,
    %50 = vector.shape_cast %47 : vector<1x8xf32> to vector<1x1x8xf32>
    %c0_42 = arith.constant 0 : index
    %c0_43 = arith.constant 0 : index
    %c0_44 = arith.constant 0 : index
    %51 = vector.load %arg5[%c0_42, %c0_43, %c0_44] : memref<1x1x8xf32, #tpu.memory_space<vmem>>, vector<1x1x8xf32>
    tpu.vector_store %arg5[%c0_42, %c0_43, %c0_44], %50 {strides = array<i32>} : memref<1x1x8xf32, #tpu.memory_space<vmem>>, vector<1x1x8xf32>,
    return
  }
  func.func @transform_0(%arg0: i32) -> (i32, i32, i32) {
    %c0_i32 = arith.constant 0 : i32
    %c0_i32_0 = arith.constant 0 : i32
    %c0_i32_1 = arith.constant 0 : i32
    return %arg0, %c0_i32, %c0_i32_0 : i32, i32, i32
  }
  func.func @transform_1(%arg0: i32) -> (i32, i32, i32) {
    %c0_i32 = arith.constant 0 : i32
    %c0_i32_0 = arith.constant 0 : i32
    %c0_i32_1 = arith.constant 0 : i32
    %c0_i32_2 = arith.constant 0 : i32
    return %c0_i32, %c0_i32_0, %c0_i32_1 : i32, i32, i32
  }
  func.func @transform_2(%arg0: i32) -> (i32, i32) {
    %c0_i32 = arith.constant 0 : i32
    %c0_i32_0 = arith.constant 0 : i32
    %c0_i32_1 = arith.constant 0 : i32
    return %c0_i32, %c0_i32_0 : i32, i32
  }
  func.func @transform_3(%arg0: i32) -> (i32, i32, i32) {
    %c0_i32 = arith.constant 0 : i32
    %c0_i32_0 = arith.constant 0 : i32
    %c0_i32_1 = arith.constant 0 : i32
    return %arg0, %c0_i32, %c0_i32_0 : i32, i32, i32
  }
  func.func @transform_4(%arg0: i32) -> (i32, i32, i32) {
    %c0_i32 = arith.constant 0 : i32
    %c0_i32_0 = arith.constant 0 : i32
    %c0_i32_1 = arith.constant 0 : i32
    return %arg0, %c0_i32, %c0_i32_0 : i32, i32, i32
  }
}

module attributes {stable_mosaic.version = 11 : i64} {
  func.func @_conv_bn_pool_kernel(%arg0: i32, %arg1: memref<1x8x8xf32, #tpu.memory_space<vmem>>, %arg2: memref<4x8x8xf32, #tpu.memory_space<vmem>>, %arg3: memref<1x8xf32, #tpu.memory_space<vmem>>, %arg4: memref<1x8xf32, #tpu.memory_space<vmem>>, %arg5: memref<1x8xf32, #tpu.memory_space<vmem>>, %arg6: memref<1x8x8xf32, #tpu.memory_space<vmem>>, %arg7: memref<1x10x8xf32, #tpu.memory_space<vmem>>) attributes {dimension_semantics = [#tpu.dimension_semantics<parallel>], iteration_bounds = array<i64: 2>, scalar_prefetch = 0 : i64, scratch_operands = 1 : i64, tpu.core_type = #tpu.core_type<tc>, window_params = [{transform_indices = @transform_0, window_bounds = array<i64: 1, 8, 8>}, {pipeline_mode = #tpu.pipeline_mode<synchronous>, transform_indices = @transform_1, window_bounds = array<i64: 4, 8, 8>}, {pipeline_mode = #tpu.pipeline_mode<synchronous>, transform_indices = @transform_2, window_bounds = array<i64: 1, 8>}, {pipeline_mode = #tpu.pipeline_mode<synchronous>, transform_indices = @transform_3, window_bounds = array<i64: 1, 8>}, {pipeline_mode = #tpu.pipeline_mode<synchronous>, transform_indices = @transform_4, window_bounds = array<i64: 1, 8>}, {transform_indices = @transform_5, window_bounds = array<i64: 1, 8, 8>}]} {
    %c0 = arith.constant 0 : index
    %c0_0 = arith.constant 0 : index
    %c0_1 = arith.constant 0 : index
    %0 = vector.load %arg1[%c0, %c0_0, %c0_1] : memref<1x8x8xf32, #tpu.memory_space<vmem>>, vector<1x8x8xf32>
    %cst = arith.constant 0.000000e+00 : f32
    %1 = vector.broadcast %cst : f32 to vector<1x1x8xf32>
    %c0_2 = arith.constant 0 : index
    %c0_3 = arith.constant 0 : index
    %c0_4 = arith.constant 0 : index
    %2 = vector.load %arg7[%c0_2, %c0_3, %c0_4] : memref<1x10x8xf32, #tpu.memory_space<vmem>>, vector<1x1x8xf32>
    tpu.vector_store %arg7[%c0_2, %c0_3, %c0_4], %1 {strides = array<i32>} : memref<1x10x8xf32, #tpu.memory_space<vmem>>, vector<1x1x8xf32>,
    %c0_5 = arith.constant 0 : index
    %c9 = arith.constant 9 : index
    %c0_6 = arith.constant 0 : index
    %3 = vector.load %arg7[%c0_5, %c9, %c0_6] : memref<1x10x8xf32, #tpu.memory_space<vmem>>, vector<1x1x8xf32>
    tpu.vector_store %arg7[%c0_5, %c9, %c0_6], %1 {strides = array<i32>} : memref<1x10x8xf32, #tpu.memory_space<vmem>>, vector<1x1x8xf32>,
    %c0_7 = arith.constant 0 : index
    %c1 = arith.constant 1 : index
    %c0_8 = arith.constant 0 : index
    %4 = vector.load %arg7[%c0_7, %c1, %c0_8] : memref<1x10x8xf32, #tpu.memory_space<vmem>>, vector<1x8x8xf32>
    tpu.vector_store %arg7[%c0_7, %c1, %c0_8], %0 {strides = array<i32>} : memref<1x10x8xf32, #tpu.memory_space<vmem>>, vector<1x8x8xf32>,
    %5 = vector.shape_cast %0 : vector<1x8x8xf32> to vector<8x8xf32>
    %c0_9 = arith.constant 0 : index
    %c0_10 = arith.constant 0 : index
    %c0_11 = arith.constant 0 : index
    %6 = vector.load %arg7[%c0_9, %c0_10, %c0_11] : memref<1x10x8xf32, #tpu.memory_space<vmem>>, vector<1x8x8xf32>
    %7 = vector.shape_cast %6 : vector<1x8x8xf32> to vector<8x8xf32>
    %c0_12 = arith.constant 0 : index
    %c2 = arith.constant 2 : index
    %c0_13 = arith.constant 0 : index
    %8 = vector.load %arg7[%c0_12, %c2, %c0_13] : memref<1x10x8xf32, #tpu.memory_space<vmem>>, vector<1x8x8xf32>
    %9 = vector.shape_cast %8 : vector<1x8x8xf32> to vector<8x8xf32>
    %c0_14 = arith.constant 0 : index
    %c0_15 = arith.constant 0 : index
    %10 = vector.load %arg3[%c0_14, %c0_15] : memref<1x8xf32, #tpu.memory_space<vmem>>, vector<1x8xf32>
    %c0_16 = arith.constant 0 : index
    %c0_17 = arith.constant 0 : index
    %c0_18 = arith.constant 0 : index
    %11 = vector.load %arg2[%c0_16, %c0_17, %c0_18] : memref<4x8x8xf32, #tpu.memory_space<vmem>>, vector<1x8x8xf32>
    %12 = vector.shape_cast %11 : vector<1x8x8xf32> to vector<8x8xf32>
    %cst_19 = arith.constant dense<0.000000e+00> : vector<8x8xf32>
    %13 = tpu.matmul %5, %12, %cst_19 {dimension_numbers = #tpu.dot_dimension_numbers<[1], [0], [0], [1], [0, 0, 1, 1], [], []>} : vector<8x8xf32>, vector<8x8xf32>, vector<8x8xf32> -> vector<8x8xf32>
    %c1_20 = arith.constant 1 : index
    %c0_21 = arith.constant 0 : index
    %c0_22 = arith.constant 0 : index
    %14 = vector.load %arg2[%c1_20, %c0_21, %c0_22] : memref<4x8x8xf32, #tpu.memory_space<vmem>>, vector<1x8x8xf32>
    %15 = vector.shape_cast %14 : vector<1x8x8xf32> to vector<8x8xf32>
    %cst_23 = arith.constant dense<0.000000e+00> : vector<8x8xf32>
    %16 = tpu.matmul %7, %15, %cst_23 {dimension_numbers = #tpu.dot_dimension_numbers<[1], [0], [0], [1], [0, 0, 1, 1], [], []>} : vector<8x8xf32>, vector<8x8xf32>, vector<8x8xf32> -> vector<8x8xf32>
    %17 = arith.addf %13, %16 : vector<8x8xf32>
    %c2_24 = arith.constant 2 : index
    %c0_25 = arith.constant 0 : index
    %c0_26 = arith.constant 0 : index
    %18 = vector.load %arg2[%c2_24, %c0_25, %c0_26] : memref<4x8x8xf32, #tpu.memory_space<vmem>>, vector<1x8x8xf32>
    %19 = vector.shape_cast %18 : vector<1x8x8xf32> to vector<8x8xf32>
    %cst_27 = arith.constant dense<0.000000e+00> : vector<8x8xf32>
    %20 = tpu.matmul %5, %19, %cst_27 {dimension_numbers = #tpu.dot_dimension_numbers<[1], [0], [0], [1], [0, 0, 1, 1], [], []>} : vector<8x8xf32>, vector<8x8xf32>, vector<8x8xf32> -> vector<8x8xf32>
    %c3 = arith.constant 3 : index
    %c0_28 = arith.constant 0 : index
    %c0_29 = arith.constant 0 : index
    %21 = vector.load %arg2[%c3, %c0_28, %c0_29] : memref<4x8x8xf32, #tpu.memory_space<vmem>>, vector<1x8x8xf32>
    %22 = vector.shape_cast %21 : vector<1x8x8xf32> to vector<8x8xf32>
    %cst_30 = arith.constant dense<0.000000e+00> : vector<8x8xf32>
    %23 = tpu.matmul %9, %22, %cst_30 {dimension_numbers = #tpu.dot_dimension_numbers<[1], [0], [0], [1], [0, 0, 1, 1], [], []>} : vector<8x8xf32>, vector<8x8xf32>, vector<8x8xf32> -> vector<8x8xf32>
    %24 = arith.addf %20, %23 : vector<8x8xf32>
    %25 = vector.broadcast %10 : vector<1x8xf32> to vector<8x8xf32>
    %26 = arith.addf %17, %25 : vector<8x8xf32>
    %cst_31 = arith.constant 0.000000e+00 : f32
    %27 = vector.broadcast %cst_31 : f32 to vector<8x8xf32>
    %28 = arith.maximumf %26, %27 : vector<8x8xf32>
    %29 = vector.broadcast %10 : vector<1x8xf32> to vector<8x8xf32>
    %30 = arith.addf %24, %29 : vector<8x8xf32>
    %cst_32 = arith.constant 0.000000e+00 : f32
    %31 = vector.broadcast %cst_32 : f32 to vector<8x8xf32>
    %32 = arith.maximumf %30, %31 : vector<8x8xf32>
    %c0_33 = arith.constant 0 : index
    %c0_34 = arith.constant 0 : index
    %33 = vector.load %arg4[%c0_33, %c0_34] : memref<1x8xf32, #tpu.memory_space<vmem>>, vector<1x8xf32>
    %c0_35 = arith.constant 0 : index
    %c0_36 = arith.constant 0 : index
    %34 = vector.load %arg5[%c0_35, %c0_36] : memref<1x8xf32, #tpu.memory_space<vmem>>, vector<1x8xf32>
    %35 = vector.broadcast %33 : vector<1x8xf32> to vector<8x8xf32>
    %36 = arith.mulf %28, %35 : vector<8x8xf32>
    %37 = vector.broadcast %34 : vector<1x8xf32> to vector<8x8xf32>
    %38 = arith.addf %36, %37 : vector<8x8xf32>
    %39 = vector.broadcast %33 : vector<1x8xf32> to vector<8x8xf32>
    %40 = arith.mulf %32, %39 : vector<8x8xf32>
    %41 = vector.broadcast %34 : vector<1x8xf32> to vector<8x8xf32>
    %42 = arith.addf %40, %41 : vector<8x8xf32>
    %43 = arith.maximumf %38, %42 : vector<8x8xf32>
    %44 = vector.shape_cast %43 : vector<8x8xf32> to vector<1x8x8xf32>
    %c0_37 = arith.constant 0 : index
    %c0_38 = arith.constant 0 : index
    %c0_39 = arith.constant 0 : index
    %45 = vector.load %arg6[%c0_37, %c0_38, %c0_39] : memref<1x8x8xf32, #tpu.memory_space<vmem>>, vector<1x8x8xf32>
    tpu.vector_store %arg6[%c0_37, %c0_38, %c0_39], %44 {strides = array<i32>} : memref<1x8x8xf32, #tpu.memory_space<vmem>>, vector<1x8x8xf32>,
    return
  }
  func.func @transform_0(%arg0: i32) -> (i32, i32, i32) {
    %c0_i32 = arith.constant 0 : i32
    %c0_i32_0 = arith.constant 0 : i32
    %c0_i32_1 = arith.constant 0 : i32
    return %arg0, %c0_i32, %c0_i32_0 : i32, i32, i32
  }
  func.func @transform_1(%arg0: i32) -> (i32, i32, i32) {
    %c0_i32 = arith.constant 0 : i32
    %c0_i32_0 = arith.constant 0 : i32
    %c0_i32_1 = arith.constant 0 : i32
    %c0_i32_2 = arith.constant 0 : i32
    return %c0_i32, %c0_i32_0, %c0_i32_1 : i32, i32, i32
  }
  func.func @transform_2(%arg0: i32) -> (i32, i32) {
    %c0_i32 = arith.constant 0 : i32
    %c0_i32_0 = arith.constant 0 : i32
    %c0_i32_1 = arith.constant 0 : i32
    return %c0_i32, %c0_i32_0 : i32, i32
  }
  func.func @transform_3(%arg0: i32) -> (i32, i32) {
    %c0_i32 = arith.constant 0 : i32
    %c0_i32_0 = arith.constant 0 : i32
    %c0_i32_1 = arith.constant 0 : i32
    return %c0_i32, %c0_i32_0 : i32, i32
  }
  func.func @transform_4(%arg0: i32) -> (i32, i32) {
    %c0_i32 = arith.constant 0 : i32
    %c0_i32_0 = arith.constant 0 : i32
    %c0_i32_1 = arith.constant 0 : i32
    return %c0_i32, %c0_i32_0 : i32, i32
  }
  func.func @transform_5(%arg0: i32) -> (i32, i32, i32) {
    %c0_i32 = arith.constant 0 : i32
    %c0_i32_0 = arith.constant 0 : i32
    %c0_i32_1 = arith.constant 0 : i32
    return %arg0, %c0_i32, %c0_i32_0 : i32, i32, i32
  }
}

</mosaic_0001>

<bundles_post_ra>
// kernel: basic_conv_block.3
= control target key start
LH: loop header
LB: loop body
LE: loop exit
PB: predicated region body
PF: predicated region fallthrough
CT: control target
= control target key end

     0   :  { %s705_s18 = smov 0   ;;  %s760_s0 = inlined_call_operand.vmem [shape: f32[2,8,8], index: 0, kind: input, shape index: {}]   ;;  %s761_s1 = inlined_call_operand.vmem [shape: f32[4,8,8], index: 1, kind: input, shape index: {}]   ;;  %s762_s2 = inlined_call_operand.vmem [shape: f32[1,8], index: 2, kind: input, shape index: {}]   ;;  %s763_s3 = inlined_call_operand.vmem [shape: f32[1,8], index: 3, kind: input, shape index: {}]   ;;  %s764_s4 = inlined_call_operand.vmem [shape: f32[1,8], index: 4, kind: input, shape index: {}]   ;;  %s765_s5 = inlined_call_operand.vmem [shape: f32[2,8,8], index: 5, kind: output, shape index: {}]  }
   0x1 LB: > { %s608_s19 = sadd.s32 4294967295, %s671_s18   ;;  %p612_p0 = scmp.ge.s32.totalorder %s671_s18, 1  ;;  %s671_s18 = sphi %s705_s18, %s15_s18  }
   0x2   : > { %p186_p1 = scmp.lt.s32.totalorder %s671_s18, 3 }
   0x4   : > { %p187_p2 = pnand %p612_p0, %p186_p1 }
   0x5   : > { %p212_p3 = scmp.lt.s32.totalorder (!%p187_p2), %s608_s19, 1 }
   0x6   : > { %190 = sbr.rel (%p187_p2) target bundleno = 233 (0xe9), region = 40 }
   0xb   : > { %v229_v0 = vld [vmem:[%s761_s1] sm:$0xff]  ;;  %v615_v1 = vld [vmem:[%s761_s1 + $0x8] sm:$0xff]  ;;  %v673_v2 = vmov 0.0   ;;  %vm221_vm0 = vcmask 57344   ;;  %vm674_vm1 = vmmov 0   ;;  %s767_s19 = smov (!%p212_p3, %s608_s19), 1 }
   0xc   : > { %640 = vmatprep.subr.mxu1 %v673_v2  ;;  %635 = vmatprep.subr.mxu0 %v673_v2  ;;  %222 = vst.msk [vmem:[#allocation2] sm:$0x1] %vm221_vm0, %v673_v2  ;;  %223 = vst.msk [vmem:[#allocation2 + $0x9] sm:$0x1] %vm221_vm0, %v673_v2  ;;  %s613_s24 = sshll.u32 %s767_s19, 3  ;;  %vm224_vm2 = vcmask 64512  }
   0xd   : > { %641 = vmatpush3.msra.mxu1 %v229_v0  ;;  %642 = vmatprep.mubr.msk.f32.mxu1 %vm674_vm1, %v673_v2  ;;  %s215_s27 = scalar_lea.vmem %s760_s0, %s613_s24  ;;  %v618_v3 = vld [vmem:[%s761_s1 + $0x10] sm:$0xff]  ;;  %v619_v5 = vld [vmem:[%s761_s1 + $0x18] sm:$0xff]  ;;  %v622_v12 = vld [vmem:[%s762_s2] ss:$0 sm:$0xff]  ;;  %s219_s15 = scalar_lea.vmem %s765_s5, %s613_s24 }
   0xe   : > { %636 = vmatpush3.msra.mxu0 %v615_v1  ;;  %637 = vmatprep.mubr.msk.f32.mxu0 %vm674_vm1, %v673_v2  ;;  %v220_v4 = vld [vmem:[%s215_s27] sm:$0xff] }
   0xf   : > { %645 = vmatprep.subr.mxu0 %v673_v2  ;;  %650 = vmatprep.subr.mxu1 %v673_v2  ;;  %225 = vst.msk [vmem:[#allocation2 + $0x1] sm:$0xff] %vm224_vm2, %v220_v4  ;;  %v623_v20 = vld [vmem:[%s763_s3] ss:$0 sm:$0xff] }
  0x10   : > { %643 = vmatmul.mubr.msk.f32.vlgmr.msra.gmra.mxu1 %vm224_vm2, %v220_v4  ;;  %v624_v25 = vld [vmem:[%s764_s4] ss:$0 sm:$0xff] }
  0x11   : > { %651 = vmatpush3.msra.mxu1 %v618_v3  ;;  %652 = vmatprep.mubr.msk.f32.mxu1 %vm674_vm1, %v673_v2 }
  0x14   : > { %653 = vmatmul.mubr.msk.f32.vlgmr.msra.gmra.mxu1 %vm224_vm2, %v220_v4 }
  0x16   : > { %v226_v6 = vld [vmem:[#allocation2] sm:$0xff] }
  0x17   : > { %638 = vmatmul.mubr.msk.f32.vlgmr.msra.gmra.mxu0 %vm224_vm2, %v226_v6  ;;  %v227_v7 = vld [vmem:[#allocation2 + $0x2] sm:$0xff] }
  0x18   : > { %646 = vmatpush3.msra.mxu0 %v619_v5  ;;  %647 = vmatprep.mubr.msk.f32.mxu0 %vm674_vm1, %v673_v2 }
  0x1b   : > { %648 = vmatmul.mubr.msk.f32.vlgmr.msra.gmra.mxu0 %vm224_vm2, %v227_v7 }
  0xd0   : > { %v374_v8 = vpop.f32.mrf.mxu1 }
  0xd2   : > { %v644_v9 = vpop.f32.mrf.mxu1 }
  0xd4   : > { %v521_v10 = vpop.f32.mrf.mxu1 }
  0xd6   : > { %v654_v11 = vpop.f32.mrf.mxu1 }
  0xd7   : > { %v301_v13 = vpop.f32.mrf.mxu0 }
  0xd8   : > { %v375_v14 = vadd.f32 %v374_v8, %v301_v13 }
  0xd9   : > { %v639_v15 = vpop.f32.mrf.mxu0 }
  0xda   : > { %v531_v16 = vadd.f32 %v622_v12, %v375_v14 }
  0xdb   : > { %v451_v17 = vpop.f32.mrf.mxu0 }
  0xdc   : > { %v532_v18 = vmax.f32 %v531_v16, 0.0  ;;  %v522_v19 = vadd.f32 %v521_v10, %v451_v17 }
  0xdd   : > { %v649_v21 = vpop.f32.mrf.mxu0 }
  0xde   : > { %v533_v22 = vadd.f32 %v622_v12, %v522_v19  ;;  %v543_v23 = vmul.f32 %v623_v20, %v532_v18 }
  0xe0   : > { %v534_v24 = vmax.f32 %v533_v22, 0.0  ;;  %v550_v27 = vadd.f32 %v624_v25, %v543_v23 }
  0xe2   : > { %v551_v26 = vmul.f32 %v623_v20, %v534_v24 }
  0xe4   : > { %v552_v28 = vadd.f32 %v624_v25, %v551_v26 }
  0xe6   : > { %v553_v29 = vmax.f32 %v550_v27, %v552_v28 }
  0xe8   : > { %554 = vst.msk [vmem:[%s219_s15] sm:$0xff] %vm224_vm2, %v553_v29 }
  0xe9 PF: > { %s15_s18 = sadd.s32 1, %s671_s18  }
  0xea   : > { %p12_p4 = scmp.ge.s32.totalorder %s15_s18, 4  }
  0xec   :  { %14 = sbr.rel (!%p12_p4) target bundleno = 1 (0x1), region = 73 }

// kernel: basic_conv_block.2
= control target key start
LH: loop header
LB: loop body
LE: loop exit
PB: predicated region body
PF: predicated region fallthrough
CT: control target
= control target key end

     0   :  { %s1004_s15 = smov 0   ;;  %s1065_s0 = inlined_call_operand.vmem [shape: f32[2,8,8], index: 0, kind: input, shape index: {}]   ;;  %s1066_s1 = inlined_call_operand.vmem [shape: f32[4,8,8], index: 1, kind: input, shape index: {}]   ;;  %s1067_s2 = inlined_call_operand.vmem [shape: f32[1,8], index: 2, kind: input, shape index: {}]   ;;  %s1068_s3 = inlined_call_operand.vmem [shape: f32[2,1,8], index: 3, kind: output, shape index: {0}]   ;;  %s1069_s4 = inlined_call_operand.vmem [shape: f32[2,1,8], index: 4, kind: output, shape index: {1}]  }
   0x1 LB: > { %s881_s16 = sadd.s32 4294967295, %s974_s15   ;;  %p885_p0 = scmp.ge.s32.totalorder %s974_s15, 1  ;;  %s974_s15 = sphi %s1004_s15, %s15_s15  }
   0x2   : > { %p164_p1 = scmp.lt.s32.totalorder %s974_s15, 3 }
   0x4   : > { %p165_p2 = pnand %p885_p0, %p164_p1 }
   0x5   : > { %p190_p3 = scmp.lt.s32.totalorder (!%p165_p2), %s881_s16, 1 }
   0x6   : > { %168 = sbr.rel (%p165_p2) target bundleno = 627 (0x273), region = 32 }
   0xb   : > { %v209_v0 = vld [vmem:[%s1066_s1] sm:$0xff]  ;;  %v887_v1 = vld [vmem:[%s1066_s1 + $0x8] sm:$0xff]  ;;  %v976_v2 = vmov 0.0   ;;  %vm977_vm0 = vmmov 0   ;;  %vm201_vm1 = vcmask 57344   ;;  %s1071_s16 = smov (!%p190_p3, %s881_s16), 1  ;;  %v659_v24 = vlaneseq }
   0xc   : > { %922 = vmatprep.subr.mxu1 %v976_v2  ;;  %924 = vmatprep.mubr.msk.f32.mxu1 %vm977_vm0, %v976_v2  ;;  %202 = vst.msk [vmem:[#allocation2] sm:$0x1] %vm201_vm1, %v976_v2  ;;  %203 = vst.msk [vmem:[#allocation2 + $0x9] sm:$0x1] %vm201_vm1, %v976_v2  ;;  %s886_s21 = sshll.u32 %s1071_s16, 3  ;;  %vm204_vm2 = vcmask 64512   ;;  %s196_s7 = scalar_lea.vmem %s1068_s3, %s1071_s16 }
   0xd   : > { %923 = vmatpush3.msra.mxu1 %v209_v0  ;;  %917 = vmatprep.subr.mxu0 %v976_v2  ;;  %s193_s24 = scalar_lea.vmem %s1065_s0, %s886_s21  ;;  %v890_v3 = vld [vmem:[%s1066_s1 + $0x10] sm:$0xff]  ;;  %v891_v5 = vld [vmem:[%s1066_s1 + $0x18] sm:$0xff]  ;;  %v894_v12 = vld [vmem:[%s1067_s2] ss:$0 sm:$0xff]  ;;  %v978_v22 = vmov 1.0   ;;  %v660_v26 = vshrl.u32 %v659_v24, 7  ;;  %s199_s10 = scalar_lea.vmem %s1069_s4, %s1071_s16 }
   0xe   : > { %918 = vmatpush3.msra.mxu0 %v887_v1  ;;  %919 = vmatprep.mubr.msk.f32.mxu0 %vm977_vm0, %v976_v2  ;;  %v200_v4 = vld [vmem:[%s193_s24] sm:$0xff] }
   0xf   : > { %932 = vmatprep.subr.mxu1 %v976_v2  ;;  %927 = vmatprep.subr.mxu0 %v976_v2  ;;  %205 = vst.msk [vmem:[#allocation2 + $0x1] sm:$0xff] %vm204_vm2, %v200_v4  ;;  %v661_v30 = vsub.s32 0, %v660_v26 }
  0x10   : > { %925 = vmatmul.mubr.msk.f32.vlgmr.msra.gmra.mxu1 %vm204_vm2, %v200_v4 }
  0x11   : > { %933 = vmatpush3.msra.mxu1 %v890_v3  ;;  %934 = vmatprep.mubr.msk.f32.mxu1 %vm977_vm0, %v976_v2 }
  0x12   : > { %942 = vmatprep.subr.mxu1 %v976_v2 }
  0x14   : > { %935 = vmatmul.mubr.msk.f32.vlgmr.msra.gmra.mxu1 %vm204_vm2, %v200_v4 }
  0x15   : > { %944 = vmatprep.mubr.msk.f32.mxu1 %vm977_vm0, %v976_v2 }
  0x16   : > { %v206_v6 = vld [vmem:[#allocation2] sm:$0xff] }
  0x17   : > { %920 = vmatmul.mubr.msk.f32.vlgmr.msra.gmra.mxu0 %vm204_vm2, %v206_v6  ;;  %v207_v7 = vld [vmem:[#allocation2 + $0x2] sm:$0xff] }
  0x18   : > { %928 = vmatpush3.msra.mxu0 %v891_v5  ;;  %929 = vmatprep.mubr.msk.f32.mxu0 %vm977_vm0, %v976_v2 }
  0x19   : > { %937 = vmatprep.subr.mxu0 %v976_v2 }
  0x1b   : > { %930 = vmatmul.mubr.msk.f32.vlgmr.msra.gmra.mxu0 %vm204_vm2, %v207_v7 }
  0x1c   : > { %939 = vmatprep.mubr.msk.f32.mxu0 %vm977_vm0, %v976_v2 }
  0xd0   : > { %v354_v8 = vpop.f32.mrf.mxu1 }
  0xd2   : > { %v926_v9 = vpop.f32.mrf.mxu1 }
  0xd4   : > { %v501_v10 = vpop.f32.mrf.mxu1 }
  0xd6   : > { %v936_v11 = vpop.f32.mrf.mxu1 }
  0xd7   : > { %v281_v13 = vpop.f32.mrf.mxu0 }
  0xd8   : > { %v355_v14 = vadd.f32 %v354_v8, %v281_v13 }
  0xd9   : > { %v921_v15 = vpop.f32.mrf.mxu0 }
  0xda   : > { %v511_v16 = vadd.f32 %v894_v12, %v355_v14 }
  0xdb   : > { %v431_v17 = vpop.f32.mrf.mxu0 }
  0xdc   : > { %v512_v18 = vmax.f32 %v511_v16, 0.0  ;;  %v502_v19 = vadd.f32 %v501_v10, %v431_v17 }
  0xdd   : > { %v931_v20 = vpop.f32.mrf.mxu0 }
  0xde   : > { %v513_v21 = vadd.f32 %v894_v12, %v502_v19  ;;  %943 = vmatpush3.msra.mxu1 %v512_v18 }
  0xdf   : > { %945 = vmatmul.mubr.msk.f32.vlgmr.msra.gmra.mxu1 %vm204_vm2, %v978_v22  ;;  %952 = vmatprep.subr.mxu1 %v976_v2 }
  0xe0   : > { %v514_v23 = vmax.f32 %v513_v21, 0.0  ;;  %954 = vmatprep.mubr.msk.f32.mxu1 %vm977_vm0, %v976_v2 }
  0xe2   : > { %938 = vmatpush3.msra.mxu0 %v514_v23 }
  0xe3   : > { %940 = vmatmul.mubr.msk.f32.vlgmr.msra.gmra.mxu0 %vm204_vm2, %v978_v22  ;;  %947 = vmatprep.subr.mxu0 %v976_v2 }
  0xe4   : > { %949 = vmatprep.mubr.msk.f32.mxu0 %vm977_vm0, %v976_v2 }
 0x19f   : > { %v654_v25 = vpop.f32.mrf.mxu1 }
 0x1a1   : > { %v946_v27 = vpop.f32.mrf.mxu1 }
 0x1a3   : > { %v584_v28 = vpop.f32.mrf.mxu0 }
 0x1a4   : > { %v655_v29 = vadd.f32 %v654_v25, %v584_v28 }
 0x1a5   : > { %v941_v31 = vpop.f32.mrf.mxu0 }
 0x1a6   : > { %v658_v32 = vmul.f32 0.0625, %v655_v29  ;;  %807 = vst.msk [vmem:[%s196_s7] sm:$0x1] %vm201_vm1, %v655_v29 }
 0x1a8   : > { %v662_v33 = vrot.slane %v658_v32, %v661_v30 }
 0x1aa   : > { %v663_v34 = vsub.f32 %v512_v18, %v662_v33  ;;  %v664_v35 = vsub.f32 %v514_v23, %v662_v33 }
 0x1ac   : > { %v665_v36 = vmul.f32 %v663_v34, %v663_v34  ;;  %v666_v37 = vmul.f32 %v664_v35, %v664_v35 }
 0x1ae   : > { %948 = vmatpush3.msra.mxu0 %v666_v37  ;;  %953 = vmatpush3.msra.mxu1 %v665_v36 }
 0x1af   : > { %950 = vmatmul.mubr.msk.f32.vlgmr.msra.gmra.mxu0 %vm204_vm2, %v978_v22  ;;  %955 = vmatmul.mubr.msk.f32.vlgmr.msra.gmra.mxu1 %vm204_vm2, %v978_v22 }
 0x26f   : > { %v733_v38 = vpop.f32.mrf.mxu0  ;;  %v803_v39 = vpop.f32.mrf.mxu1 }
 0x270   : > { %v804_v40 = vadd.f32 %v803_v39, %v733_v38 }
 0x271   : > { %v951_v41 = vpop.f32.mrf.mxu0  ;;  %v956_v42 = vpop.f32.mrf.mxu1 }
 0x272   : > { %808 = vst.msk [vmem:[%s199_s10] sm:$0x1] %vm201_vm1, %v804_v40 }
 0x273 PF: > { %s15_s15 = sadd.s32 1, %s974_s15  }
 0x274   : > { %p12_p4 = scmp.ge.s32.totalorder %s15_s15, 4  }
 0x276   :  { %14 = sbr.rel (!%p12_p4) target bundleno = 1 (0x1), region = 77 }

</bundles_post_ra>
